<compile_context>
chip_gen: v7x
topology: tpu7x:2x2x1
jax: 0.10.0
libtpu: 0.0.40
codegen_flags: <defaults>
</compile_context>

<pallas_src>
import functools
import math

import numpy as np
import jax
import jax.numpy as jnp
from jax import lax
from jax.experimental import pallas as pl
from jax.experimental.pallas import tpu as pltpu

BN_EPS = 1e-5
VMEM_LIMIT = 32 * 1024 * 1024   # explicit scoped-VMEM limit (safe on v5e/v6e/v7x)


# --------------------- pass 1: per-tile BatchNorm statistics ---------------------
def _stats_kernel(x_ref, w_ref, sum_ref, ssq_ref):
    # bf16 x bf16 -> f32 accumulation on the MXU; h lives only in VMEM/vregs.
    h = jnp.dot(x_ref[...], w_ref[...], preferred_element_type=jnp.float32)  # [T, C]
    # Per-tile partial sums: each grid step owns a distinct output block, so the
    # grid axis stays "parallel" (v7x megacore friendly). Zero-padded rows of x
    # (and no linear bias) contribute exactly zero, so padding never biases stats.
    sum_ref[0] = jnp.sum(h, axis=0, keepdims=True)
    ssq_ref[0] = jnp.sum(h * h, axis=0, keepdims=True)


# ------------------ pass 2: Linear + folded BN + ReLU -> bf16 hr ------------------
def _hr_kernel(x_ref, w_ref, scale_ref, shift_ref, hr_ref):
    h = jnp.dot(x_ref[...], w_ref[...], preferred_element_type=jnp.float32)  # [T, C]
    hr = jnp.maximum(h * scale_ref[...] + shift_ref[...], 0.0)
    hr_ref[...] = hr.astype(hr_ref.dtype)   # bf16 store: halves the stream pass 3 re-reads


# ------------- pass 3: streaming neighborhood max over source tiles ---------------
def _pool_kernel(mask_ref, hr_ref, out_ref, *, cout):
    s = pl.program_id(1)

    @pl.when(s == 0)
    def _():
        # 0 is a valid identity: hr >= 0 after ReLU and every real node has a self loop.
        out_ref[...] = jnp.zeros_like(out_ref)

    m = mask_ref[...] != 0          # int8 -> bool compare (no int8->f32 expansion)
    hr = hr_ref[...]                # [TS, C] bf16

    # out[c, i] = max_j mask[j, i] * hr[j, c]   (running max over source tiles)
    # bf16 select + sublane max per channel; Cout is tiny so a static unroll is fine.
    # TODO(synk): for Cout >> 8 switch to lax.fori_loop(..., unroll=2-4) to avoid
    #             spilling past the 64-vreg file.
    reds = []
    for c in range(cout):
        contrib = jnp.where(m, hr[:, c:c + 1], 0.0)                       # [TS, TT] bf16
        reds.append(jnp.max(contrib, axis=0, keepdims=True).astype(jnp.float32))
    step_max = jnp.concatenate(reds, axis=0)                              # [C, TT] f32 (1 vreg)
    out_ref[...] = jnp.maximum(out_ref[...], step_max)                    # single full-block update


def down_and_neighbor_maxpool(x_pad, w, gamma, beta, mask_sm, n_real, *, tile=128):
    """x_pad: [N_pad, Cin] f32 (zero-padded rows); w: [Cin, Cout];
       mask_sm: [N_pad, N_pad] int8 adjacency, mask_sm[source, target], self loops included.
       Returns pooled features [N_pad, Cout] f32 (padded rows are 0).
       Raise `tile` to 512 at production N."""
    n_pad, cin = x_pad.shape
    cout = w.shape[1]
    assert n_pad % tile == 0
    nt = n_pad // tile

    xb = x_pad.astype(jnp.bfloat16)
    wb = w.astype(jnp.bfloat16)

    # ---- pass 1: per-tile partial sum / sumsq of h = x @ W (h never hits HBM) ----
    sums, ssqs = pl.pallas_call(
        _stats_kernel,
        grid=(nt,),
        in_specs=[
            pl.BlockSpec((tile, cin), lambda r: (r, 0)),
            pl.BlockSpec((cin, cout), lambda r: (0, 0)),
        ],
        out_specs=[
            pl.BlockSpec((1, 1, cout), lambda r: (r, 0, 0)),
            pl.BlockSpec((1, 1, cout), lambda r: (r, 0, 0)),
        ],
        out_shape=[
            jax.ShapeDtypeStruct((nt, 1, cout), jnp.float32),
            jax.ShapeDtypeStruct((nt, 1, cout), jnp.float32),
        ],
        compiler_params=pltpu.CompilerParams(
            dimension_semantics=("parallel",),
            vmem_limit_bytes=VMEM_LIMIT,
        ),
    )(xb, wb)
    s1 = jnp.sum(sums, axis=0)      # [1, Cout]
    s2 = jnp.sum(ssqs, axis=0)      # [1, Cout]

    # ---- fold BatchNorm (training forward: biased batch variance) into scale/shift ----
    inv_n = 1.0 / float(n_real)
    mean = s1 * inv_n
    var = jnp.maximum(s2 * inv_n - mean * mean, 0.0)      # biased, like PyTorch BN fwd
    scale = gamma.reshape(1, -1) * lax.rsqrt(var + BN_EPS)
    shift = beta.reshape(1, -1) - mean * scale
    # (Linear bias omitted entirely: BN's mean subtraction cancels it exactly.)

    # ---- pass 2: hr = relu(h * scale + shift), hoisted out of the pooling loop ----
    hr = pl.pallas_call(
        _hr_kernel,
        grid=(nt,),
        in_specs=[
            pl.BlockSpec((tile, cin), lambda r: (r, 0)),
            pl.BlockSpec((cin, cout), lambda r: (0, 0)),
            pl.BlockSpec((1, cout), lambda r: (0, 0)),
            pl.BlockSpec((1, cout), lambda r: (0, 0)),
        ],
        out_specs=pl.BlockSpec((tile, cout), lambda r: (r, 0)),
        out_shape=jax.ShapeDtypeStruct((n_pad, cout), jnp.bfloat16),
        compiler_params=pltpu.CompilerParams(
            dimension_semantics=("parallel",),
            vmem_limit_bytes=VMEM_LIMIT,
        ),
    )(xb, wb, scale.astype(jnp.float32), shift.astype(jnp.float32))

    # ---- pass 3: streaming neighborhood max (bf16 inner math, lane-dense output) ----
    # TODO(synk): on v5e (no bf16 VALU) keep this path in f32 and consider
    #             pipeline_mode=pl.Buffered(3) on the mask spec once tile >= 512.
    pooled_t = pl.pallas_call(
        functools.partial(_pool_kernel, cout=cout),
        grid=(nt, nt),                                        # (target tiles, source tiles)
        in_specs=[
            pl.BlockSpec((tile, tile), lambda t, s: (s, t)),  # int8 mask [src, tgt]
            pl.BlockSpec((tile, cout), lambda t, s: (s, 0)),  # hr source tile (bf16)
        ],
        out_specs=pl.BlockSpec((cout, tile), lambda t, s: (0, t)),   # lane-dense, resident over s
        out_shape=jax.ShapeDtypeStruct((cout, n_pad), jnp.float32),
        compiler_params=pltpu.CompilerParams(
            dimension_semantics=("parallel", "arbitrary"),
            vmem_limit_bytes=VMEM_LIMIT,
        ),
    )(mask_sm, hr)

    return pooled_t.T                                         # [N_pad, Cout]


# ------------------------------ FPS (host-side glue) ------------------------------
def fps_indices(pos, batch, ratio):
    """Farthest-point sampling per graph; returns sorted global indices (glue)."""
    # TODO(synk): torch_geometric fps uses a random start point; we start at node 0 per graph.
    pos_np = np.asarray(pos)
    batch_np = np.asarray(batch)
    out = []
    for b in np.unique(batch_np):
        seg = np.nonzero(batch_np == b)[0]
        n = seg.shape[0]
        k = int(math.ceil(n * ratio))
        p = pos_np[seg]
        sel = [0]
        d = np.sum((p - p[0]) ** 2, axis=-1)
        for _ in range(k - 1):
            nxt = int(np.argmax(d))
            sel.append(nxt)
            d = np.minimum(d, np.sum((p - p[nxt]) ** 2, axis=-1))
        out.extend(sorted(int(seg[s]) for s in sel))
    return np.asarray(out, dtype=np.int32)


if __name__ == "__main__":
    key = jax.random.PRNGKey(0)
    TILE = 128
    NODES_PER_GRAPH = 128
    NUM_GRAPHS = 2
    N = NODES_PER_GRAPH * NUM_GRAPHS            # 256
    CIN, COUT = 3, 8
    N_PAD = ((N + TILE - 1) // TILE) * TILE     # 256 -> 2x2 node-tile grid in pass 3

    k1, k2, k3, k4 = jax.random.split(key, 4)
    x = jax.random.normal(k1, (N, CIN), jnp.float32)
    pos = jax.random.normal(k2, (N, 3), jnp.float32)
    batch = jnp.repeat(jnp.arange(NUM_GRAPHS, dtype=jnp.int32), NODES_PER_GRAPH)
    y = jax.random.randint(k3, (N,), 0, 5).astype(jnp.int32)

    # edge_index: ring graph inside each sample (both directions)
    src, dst = [], []
    for g in range(NUM_GRAPHS):
        base = g * NODES_PER_GRAPH
        for i in range(NODES_PER_GRAPH):
            a = base + i
            b = base + (i + 1) % NODES_PER_GRAPH
            src += [a, b]
            dst += [b, a]
    src = np.asarray(src, np.int64)
    dst = np.asarray(dst, np.int64)

    # Parameters of self.down = Linear(CIN, COUT) + BatchNorm1d(COUT) + ReLU (deterministic init)
    bound = 1.0 / math.sqrt(CIN)
    w = jax.random.uniform(k4, (CIN, COUT), jnp.float32, -bound, bound)
    gamma = jnp.ones((COUT,), jnp.float32)      # BN default weight
    beta = jnp.zeros((COUT,), jnp.float32)      # BN default bias

    # Dense adjacency with self loops, SOURCE-major [source, target], int8, zero-padded.
    mask_np = np.zeros((N_PAD, N_PAD), np.int8)
    mask_np[src, dst] = 1
    mask_np[np.arange(N), np.arange(N)] = 1
    mask_sm = jnp.asarray(mask_np)

    x_pad = jnp.zeros((N_PAD, CIN), jnp.float32).at[:N].set(x)

    # ---- Pallas kernels: down MLP (Linear+BN+ReLU) + neighborhood max pooling ----
    pooled = down_and_neighbor_maxpool(x_pad, w, gamma, beta, mask_sm, N, tile=TILE)[:N]
    pooled = jax.block_until_ready(pooled)

    # ---- pure-JAX reference (same bf16 rounding of x/w; kernel pools a bf16 hr stream,
    #      so tolerances are set to the bf16 ulp ~0.4% rel) ----
    xb = x.astype(jnp.bfloat16).astype(jnp.float32)
    wb = w.astype(jnp.bfloat16).astype(jnp.float32)
    h_ref = xb @ wb
    mean = h_ref.mean(0, keepdims=True)
    var = ((h_ref - mean) ** 2).mean(0, keepdims=True)
    scale_r = gamma.reshape(1, -1) * lax.rsqrt(var + BN_EPS)
    shift_r = beta.reshape(1, -1) - mean * scale_r
    hr_ref = jnp.maximum(h_ref * scale_r + shift_r, 0.0)
    mask_tm = jnp.asarray(mask_np[:N, :N].T, jnp.float32)    # [target, source]
    ref = jnp.max(jnp.where(mask_tm[:, :, None] > 0, hr_ref[None, :, :], -jnp.inf), axis=1)
    assert jnp.allclose(pooled, ref, atol=1e-2, rtol=1e-2), "kernel/reference mismatch"

    # ---- FPS subsampling (ratio = 0.5) and index-select of x/pos/batch/y (glue) ----
    idx = fps_indices(pos, batch, 0.5)
    x_out = pooled[idx]
    pos_out = pos[idx]
    batch_out = batch[idx]
    y_out = y[idx]
    jax.block_until_ready((x_out, pos_out, batch_out, y_out))

    print("KERNEL_OK")
</pallas_src>

<mosaic_0001>
module attributes {stable_mosaic.version = 11 : i64} {
  func.func @_stats_kernel(%arg0: i32, %arg1: memref<128x3xbf16, #tpu.memory_space<vmem>>, %arg2: memref<3x8xbf16, #tpu.memory_space<vmem>>, %arg3: memref<1x1x8xf32, #tpu.memory_space<vmem>>, %arg4: memref<1x1x8xf32, #tpu.memory_space<vmem>>) attributes {dimension_semantics = [#tpu.dimension_semantics<parallel>], iteration_bounds = array<i64: 2>, scalar_prefetch = 0 : i64, scratch_operands = 0 : i64, tpu.core_type = #tpu.core_type<tc>, window_params = [{transform_indices = @transform_0, window_bounds = array<i64: 128, 3>}, {pipeline_mode = #tpu.pipeline_mode<synchronous>, transform_indices = @transform_1, window_bounds = array<i64: 3, 8>}, {transform_indices = @transform_2, window_bounds = array<i64: 1, 1, 8>}, {transform_indices = @transform_3, window_bounds = array<i64: 1, 1, 8>}]} {
    %c0 = arith.constant 0 : index
    %c0_0 = arith.constant 0 : index
    %0 = vector.load %arg1[%c0, %c0_0] : memref<128x3xbf16, #tpu.memory_space<vmem>>, vector<128x3xbf16>
    %c0_1 = arith.constant 0 : index
    %c0_2 = arith.constant 0 : index
    %1 = vector.load %arg2[%c0_1, %c0_2] : memref<3x8xbf16, #tpu.memory_space<vmem>>, vector<3x8xbf16>
    %cst = arith.constant dense<0.000000e+00> : vector<128x8xf32>
    %2 = tpu.matmul %0, %1, %cst {dimension_numbers = #tpu.dot_dimension_numbers<[1], [0], [0], [1], [0, 0, 1, 1], [], []>} : vector<128x3xbf16>, vector<3x8xbf16>, vector<128x8xf32> -> vector<128x8xf32>
    %cst_3 = arith.constant dense<0.000000e+00> : vector<8xf32>
    %3 = vector.multi_reduction <add>, %2, %cst_3 [0] : vector<128x8xf32> to vector<8xf32>
    %4 = vector.shape_cast %3 : vector<8xf32> to vector<1x8xf32>
    %c0_4 = arith.constant 0 : index
    %c0_5 = arith.constant 0 : index
    %c0_6 = arith.constant 0 : index
    %5 = vector.load %arg3[%c0_4, %c0_5, %c0_6] : memref<1x1x8xf32, #tpu.memory_space<vmem>>, vector<1x1x8xf32>
    %6 = vector.shape_cast %5 : vector<1x1x8xf32> to vector<1x8xf32>
    %7 = vector.shape_cast %4 : vector<1x8xf32> to vector<1x1x8xf32>
    tpu.vector_store %arg3[%c0_4, %c0_5, %c0_6], %7 {strides = array<i32>} : memref<1x1x8xf32, #tpu.memory_space<vmem>>, vector<1x1x8xf32>,
    %8 = arith.mulf %2, %2 : vector<128x8xf32>
    %cst_7 = arith.constant dense<0.000000e+00> : vector<8xf32>
    %9 = vector.multi_reduction <add>, %8, %cst_7 [0] : vector<128x8xf32> to vector<8xf32>
    %10 = vector.shape_cast %9 : vector<8xf32> to vector<1x8xf32>
    %c0_8 = arith.constant 0 : index
    %c0_9 = arith.constant 0 : index
    %c0_10 = arith.constant 0 : index
    %11 = vector.load %arg4[%c0_8, %c0_9, %c0_10] : memref<1x1x8xf32, #tpu.memory_space<vmem>>, vector<1x1x8xf32>
    %12 = vector.shape_cast %11 : vector<1x1x8xf32> to vector<1x8xf32>
    %13 = vector.shape_cast %10 : vector<1x8xf32> to vector<1x1x8xf32>
    tpu.vector_store %arg4[%c0_8, %c0_9, %c0_10], %13 {strides = array<i32>} : memref<1x1x8xf32, #tpu.memory_space<vmem>>, vector<1x1x8xf32>,
    return
  }
  func.func @transform_0(%arg0: i32) -> (i32, i32) {
    %c0_i32 = arith.constant 0 : i32
    %c0_i32_0 = arith.constant 0 : i32
    return %arg0, %c0_i32 : i32, i32
  }
  func.func @transform_1(%arg0: i32) -> (i32, i32) {
    %c0_i32 = arith.constant 0 : i32
    %c0_i32_0 = arith.constant 0 : i32
    %c0_i32_1 = arith.constant 0 : i32
    return %c0_i32, %c0_i32_0 : i32, i32
  }
  func.func @transform_2(%arg0: i32) -> (i32, i32, i32) {
    %c0_i32 = arith.constant 0 : i32
    %c0_i32_0 = arith.constant 0 : i32
    %c0_i32_1 = arith.constant 0 : i32
    return %arg0, %c0_i32, %c0_i32_0 : i32, i32, i32
  }
  func.func @transform_3(%arg0: i32) -> (i32, i32, i32) {
    %c0_i32 = arith.constant 0 : i32
    %c0_i32_0 = arith.constant 0 : i32
    %c0_i32_1 = arith.constant 0 : i32
    return %arg0, %c0_i32, %c0_i32_0 : i32, i32, i32
  }
}

</mosaic_0001>

<bundles_post_ra>
// kernel: tpu_custom_call.1
= control target key start
LH: loop header
LB: loop body
LE: loop exit
PB: predicated region body
PF: predicated region fallthrough
CT: control target
= control target key end

     0   :  { %9 = vsyncpa [#allocation3], 0  ;;  %s984_s0 = inlined_call_operand.vmem [shape: bf16[256,3], index: 0, kind: input, shape index: {}]   ;;  %s985_s1 = inlined_call_operand.vmem [shape: bf16[3,8], index: 1, kind: input, shape index: {}]   ;;  %s986_s2 = inlined_call_operand.hbm [shape: f32[2,1,8], index: 2, kind: output, shape index: {0}]   ;;  %s987_s3 = inlined_call_operand.hbm [shape: f32[2,1,8], index: 3, kind: output, shape index: {1}]  }
   0x1   :  { %11 = vsyncpa [#allocation3 + $0x1], 0 }
   0x2   :  { %12 = vsyncpa [#allocation5], 0 }
   0x3   :  { %14 = vsyncpa [#allocation5 + $0x1], 0  ;;  %s801_s12 = smov 0   ;;  %s803_s13 = smov 0  }
   0x4   :  { %s805_s14 = smov 0   ;;  %s807_s15 = smov 0  }
   0x5 LB: > { %s573_s16 = sadd.s32 4294967295, %s776_s15   ;;  %s574_s17 = sadd.s32 4294967294, %s776_s15   ;;  %s776_s15 = sphi %s807_s15, %s993_s15   ;;  %s772_s14 = sphi %s805_s14, %s992_s14   ;;  %s768_s13 = sphi %s803_s13, %s991_s13   ;;  %s764_s12 = sphi %s801_s12, %s990_s12  }
   0x6   : > { %s824_s18 = sadd.s32 1, %s776_s15   ;;  %s74_s19 = sadd.s32 1, %s772_s14 }
   0x7   : > { %s71_s20 = ssub.s32 %s776_s15, %s824_s18  ;;  %p84_p0 = scmp.ne.s32.totalorder %s772_s14, %s768_s13 }
   0x8   : > { %p72_p1 = scmp.eq.s32.totalorder %s71_s20, 0  ;;  %p85_p2 = scmp.eq.s32.totalorder %s573_s16, 1 }
   0x9   : > { %p90_p3 = scmp.ne.s32.totalorder %s768_s13, %s764_s12  ;;  %p91_p4 = scmp.eq.s32.totalorder %s574_s17, 1 }
   0xa   : > { %s834_s21 = scalar_select %p72_p1, %s772_s14, %s74_s19  }
   0xb   : > { %p836_p5 = por %p85_p2, %p84_p0  ;;  %p840_p6 = por %p91_p4, %p90_p3 }
   0xc   : > { %p577_p7 = scmp.ge.s32.totalorder %s776_s15, 1  ;;  %p147_p8 = scmp.lt.s32.totalorder %s776_s15, 3 }
   0xe   : > { %p148_p9 = pnand %p577_p7, %p147_p8 }
   0xf   : > { %v197_v0 = vld [vmem:[%s985_s1] sm:$0x3] (!%p148_p9)  ;;  %vm263_vm0 = vcmask (!%p148_p9), 1040384   ;;  %vm264_vm1 = vcmask (!%p148_p9), 1041408   ;;  %s849_s26 = sshll.u32 (!%p148_p9), %s573_s16, 4  ;;  %v778_v1 = vmov (!%p148_p9), 65535  }
  0x10   : > { %151 = sbr.rel (%p148_p9) target bundleno = 324 (0x144), region = 28  ;;  %v265_v2 = vsel (!%p148_p9), %vm263_vm0, 4294967295, %v778_v1  ;;  %p175_p10 = scmp.lt.s32.totalorder (!%p148_p9), %s849_s26, 31  ;;  %vm238_vm2 = vcmask (!%p148_p9), 23552   ;;  %vm367_vm3 = vcmask (!%p148_p9), 64512   ;;  %vm405_vm4 = vcmask (!%p148_p9), 57344  }
  0x11   : > { %v266_v3 = vsel (!%p148_p9), %vm264_vm1, %v265_v2, 0  ;;  %s897_s5 = sand.u32 (!%p148_p9), 1, %s768_s13   ;;  %s907_s16 = scalar_lea.hbm (!%p148_p9), %s986_s2, %s849_s26 }
  0x12   : > { %v268_v4 = vand.u32 (!%p148_p9), %v266_v3, %v197_v0  ;;  %s167_s6 = scalar_lea.vmem (!%p148_p9), [#allocation2], %s897_s5  ;;  %s173_s8 = scalar_lea.vmem (!%p148_p9), [#allocation4], %s897_s5 }
  0x13   : > { %s478_s7 = sshll.u32 (!%p148_p9), %s167_s6, 4  ;;  %s491_s9 = sshll.u32 (!%p148_p9), %s173_s8, 4  ;;  %s909_s7 = int_to_ptr.vmem [resolvable:$true] %s478_s7  ;;  %s918_s9 = int_to_ptr.vmem [resolvable:$true] %s491_s9 }
  0x14   : > { %609 = vmatprep.subr.bf16.mxu0 (!%p148_p9), %v268_v4  ;;  %627 = vmatprep.subr.bf16.mxu1 (!%p148_p9), %v268_v4  ;;  %s916_s20 = scalar_lea.hbm (!%p148_p9), %s987_s3, %s849_s26  ;;  %s462_s24 = scalar_lea.sflag (!%p148_p9), [#allocation3], %s897_s5 }
  0x15   : > { %610 = vmatpush3.bf16.msra.mxu0 (!%p148_p9), %v268_v4  ;;  %628 = vmatpush3.bf16.msra.mxu1 (!%p148_p9), %v268_v4  ;;  %s682_s25 = scalar_lea.vmem (!%p148_p9), %s909_s7, 16 }
  0x16   : > { %p683_p11 = scmp.ne.s32.totalorder (!%p148_p9), %s909_s7, %s682_s25 }
  0x17   : > { %s176_s27 = scalar_select %p175_p10, %s849_s26, 31 }
  0x18   : > { %p684_p12 = pnand %p683_p11, %p836_p5 }
  0x19   : > { %s579_s28 = sshll.u32 %s176_s27, 2  ;;  %s779_s27 = smov [#allocation2]  }
  0x1a   : > { %s178_s4 = scalar_lea.vmem %s984_s0, %s579_s28  ;;  %p685_p13 = pneg %p684_p12 }
  0x1b   : > { %v674_v5 = vld [vmem:[%s178_s4] sm:$0xff]   ;;  %v675_v6 = vld [vmem:[%s178_s4 + $0x8] sm:$0xff]   ;;  %v676_v7 = vld [vmem:[%s178_s4 + $0x10] sm:$0xff]   ;;  %s686_s28 = sshll.u32 %s779_s27, 4  ;;  %s687_s28 = int_to_ptr.vmem [resolvable:$false] %s686_s28 }
  0x1c   : > { %611 = vmatprep.mubr.msk.bf16.mxu0 %vm238_vm2, %v674_v5  ;;  %v678_v8 = vld [vmem:[%s178_s4 + $0x20] sm:$0xff]   ;;  %v679_v9 = vld [vmem:[%s178_s4 + $0x28] sm:$0xff]   ;;  %v680_v10 = vld [vmem:[%s178_s4 + $0x30] sm:$0xff]   ;;  %s688_s29 = scalar_lea.vmem %s687_s28, 32  ;;  %p689_p0 = scmp.lt.s32.totalorder %s909_s7, %s687_s28 }
  0x1d   : > { %612 = vmatmul.mubr.msk.bf16.vlgmr.msra.gmra.mrb[0].mxu0 %vm238_vm2, %v675_v6  ;;  %619 = vmatprep.mubr.msk.bf16.mxu1 %vm238_vm2, %v678_v8  ;;  %v677_v11 = vld [vmem:[%s178_s4 + $0x18] sm:$0xff]   ;;  %p690_p1 = scmp.lt.s32.totalorder %s688_s29, %s682_s25 }
  0x1e   : > { %615 = vmatprep.mubr.msk.bf16.mxu0 %vm238_vm2, %v676_v7  ;;  %620 = vmatmul.mubr.msk.bf16.vlgmr.msra.gmra.mrb[0].mxu1 %vm238_vm2, %v679_v9  ;;  %v681_v12 = vld [vmem:[%s178_s4 + $0x38] sm:$0xff]  }
  0x1f   : > { %623 = vmatprep.mubr.msk.bf16.mxu1 %vm238_vm2, %v680_v10  ;;  %p691_p2 = por %p690_p1, %p689_p0 }
  0x21   : > { %p692_p3 = pnand %p691_p2, %p685_p13 }
  0x25   : > { %616 = vmatmul.mubr.msk.bf16.gmra.mrb[4].mxu0 %vm238_vm2, %v677_v11 }
  0x26   : > { %624 = vmatmul.mubr.msk.bf16.gmra.mrb[4].mxu1 %vm238_vm2, %v681_v12 }
  0xf0   : > { %v613_v13 = vpop.f32.mrb[0].mxu0 }
  0xf1   : > { %v304_v14 = vpop.f32.mrb[1].mxu0  ;;  %v409_v18 = vmul.f32 %v613_v13, %v613_v13  ;;  %v621_v22 = vpop.f32.mrb[0].mxu1  ;;  %v371_v25 = vsel %vm367_vm3, %v613_v13, 0.0 }
  0xf2   : > { %v407_v15 = vmul.f32 %v304_v14, %v304_v14  ;;  %v614_v16 = vpop.f32.mrb[2].mxu0  ;;  %v368_v19 = vsel %vm367_vm3, %v304_v14, 0.0  ;;  %v336_v24 = vpop.f32.mrb[1].mxu1  ;;  %v417_v8 = vmul.f32 %v621_v22, %v621_v22  ;;  %v387_v12 = vsel %vm367_vm3, %v621_v22, 0.0 }
  0xf3   : > { %v307_v17 = vpop.f32.mrb[3].mxu0  ;;  %v410_v27 = vmul.f32 %v614_v16, %v614_v16  ;;  %v622_v29 = vpop.f32.mrb[2].mxu1  ;;  %v426_v33 = vsel %vm367_vm3, %v409_v18, 0.0  ;;  %v373_v34 = vsel %vm367_vm3, %v614_v16, 0.0  ;;  %v415_v57 = vmul.f32 %v336_v24, %v336_v24 }
  0xf4   : > { %v369_v20 = vsel %vm367_vm3, %v307_v17, 0.0  ;;  %v408_v21 = vmul.f32 %v307_v17, %v307_v17  ;;  %v423_v26 = vsel %vm367_vm3, %v407_v15, 0.0  ;;  %v339_v32 = vpop.f32.mrb[3].mxu1  ;;  %v383_v0 = vsel %vm367_vm3, %v336_v24, 0.0 }
  0xf5   : > { %v370_v23 = vadd.f32 %v369_v20, %v368_v19  ;;  %v428_v39 = vsel %vm367_vm3, %v410_v27, 0.0  ;;  %v438_v4 = vsel %vm367_vm3, %v415_v57, 0.0  ;;  %v416_v5 = vmul.f32 %v339_v32, %v339_v32 }
  0xf6   : > { %v424_v28 = vsel %vm367_vm3, %v408_v21, 0.0  ;;  %v385_v9 = vsel %vm367_vm3, %v339_v32, 0.0  ;;  %v418_v13 = vmul.f32 %v622_v29, %v622_v29  ;;  %v442_v18 = vsel %vm367_vm3, %v417_v8, 0.0 }
  0xf7   : > { %v372_v30 = vadd.f32 %v371_v25, %v370_v23  ;;  %v425_v31 = vadd.f32 %v424_v28, %v423_v26  ;;  %v440_v14 = vsel %vm367_vm3, %v416_v5, 0.0  ;;  %v389_v19 = vsel %vm367_vm3, %v622_v29, 0.0 }
  0xf8   : > { %v617_v35 = vpop.f32.mrb[4].mxu0  ;;  %v444_v24 = vsel %vm367_vm3, %v418_v13, 0.0 }
  0xf9   : > { %v427_v36 = vadd.f32 %v426_v33, %v425_v31  ;;  %v320_v37 = vpop.f32.mrb[5].mxu0  ;;  %v374_v38 = vadd.f32 %v373_v34, %v372_v30  ;;  %v413_v46 = vmul.f32 %v617_v35, %v617_v35  ;;  %v625_v50 = vpop.f32.mrb[4].mxu1  ;;  %v379_v54 = vsel %vm367_vm3, %v617_v35, 0.0 }
  0xfa   : > { %v375_v40 = vsel %vm367_vm3, %v320_v37, 0.0  ;;  %v411_v41 = vmul.f32 %v320_v37, %v320_v37  ;;  %v618_v42 = vpop.f32.mrb[6].mxu0  ;;  %v352_v53 = vpop.f32.mrb[5].mxu1  ;;  %v421_v28 = vmul.f32 %v625_v50, %v625_v50  ;;  %v395_v33 = vsel %vm367_vm3, %v625_v50, 0.0 }
  0xfb   : > { %v376_v43 = vadd.f32 %v375_v40, %v374_v38  ;;  %v429_v44 = vadd.f32 %v428_v39, %v427_v36  ;;  %v323_v45 = vpop.f32.mrb[7].mxu0  ;;  %v414_v55 = vmul.f32 %v618_v42, %v618_v42  ;;  %v626_v58 = vpop.f32.mrb[6].mxu1  ;;  %v434_v62 = vsel %vm367_vm3, %v413_v46, 0.0 }
  0xfc   : > { %v430_v47 = vsel %vm367_vm3, %v411_v41, 0.0  ;;  %v377_v48 = vsel %vm367_vm3, %v323_v45, 0.0  ;;  %v412_v49 = vmul.f32 %v323_v45, %v323_v45  ;;  %v355_v61 = vpop.f32.mrb[7].mxu1  ;;  %v381_v63 = vsel %vm367_vm3, %v618_v42, 0.0 }
  0xfd   : > { %v431_v51 = vadd.f32 %v430_v47, %v429_v44  ;;  %v378_v52 = vadd.f32 %v377_v48, %v376_v43  ;;  %v436_v3 = vsel %vm367_vm3, %v414_v55, 0.0  ;;  %v419_v15 = vmul.f32 %v352_v53, %v352_v53 }
  0xfe   : > { %v432_v56 = vsel %vm367_vm3, %v412_v49, 0.0  ;;  %v391_v20 = vsel %vm367_vm3, %v352_v53, 0.0  ;;  %v420_v26 = vmul.f32 %v355_v61, %v355_v61  ;;  %v393_v30 = vsel %vm367_vm3, %v355_v61, 0.0 }
  0xff   : > { %v380_v59 = vadd.f32 %v379_v54, %v378_v52  ;;  %v433_v60 = vadd.f32 %v432_v56, %v431_v51  ;;  %v446_v25 = vsel %vm367_vm3, %v419_v15, 0.0  ;;  %v422_v29 = vmul.f32 %v626_v58, %v626_v58 }
 0x100   : > { %v448_v34 = vsel %vm367_vm3, %v420_v26, 0.0  ;;  %v450_v37 = vsel %vm367_vm3, %v421_v28, 0.0  ;;  %v397_v38 = vsel %vm367_vm3, %v626_v58, 0.0 }
 0x101   : > { %v435_v1 = vadd.f32 %v434_v62, %v433_v60  ;;  %v382_v2 = vadd.f32 %v381_v63, %v380_v59  ;;  %v452_v41 = vsel %vm367_vm3, %v422_v29, 0.0 }
 0x103   : > { %v384_v6 = vadd.f32 %v383_v0, %v382_v2  ;;  %v437_v7 = vadd.f32 %v436_v3, %v435_v1 }
 0x105   : > { %v439_v10 = vadd.f32 %v438_v4, %v437_v7  ;;  %v386_v11 = vadd.f32 %v385_v9, %v384_v6 }
 0x107   : > { %v388_v16 = vadd.f32 %v387_v12, %v386_v11  ;;  %v441_v17 = vadd.f32 %v440_v14, %v439_v10 }
 0x109   : > { %v443_v21 = vadd.f32 %v442_v18, %v441_v17  ;;  %v390_v23 = vadd.f32 %v389_v19, %v388_v16 }
 0x10b   : > { %v392_v22 = vadd.f32 %v391_v20, %v390_v23  ;;  %v445_v27 = vadd.f32 %v444_v24, %v443_v21 }
 0x10d   : > { %v447_v31 = vadd.f32 %v446_v25, %v445_v27  ;;  %v394_v32 = vadd.f32 %v393_v30, %v392_v22 }
 0x10f   : > { %v396_v35 = vadd.f32 %v395_v33, %v394_v32  ;;  %v449_v36 = vadd.f32 %v448_v34, %v447_v31 }
 0x111   : > { %v398_v39 = vadd.f32 %v397_v38, %v396_v35  ;;  %v451_v40 = vadd.f32 %v450_v37, %v449_v36 }
 0x113   : > { %v399_v42 = vrot.slane %v398_v39, 4  ;;  %v453_v43 = vadd.f32 %v452_v41, %v451_v40 }
 0x115   : > { %v400_v44 = vadd.f32 %v399_v42, %v398_v39  ;;  %v454_v45 = vrot.slane %v453_v43, 4 }
 0x117   : > { %v401_v46 = vrot.slane %v400_v44, 2  ;;  %v455_v47 = vadd.f32 %v454_v45, %v453_v43 }
 0x119   : > { %v402_v48 = vadd.f32 %v401_v46, %v400_v44  ;;  %v456_v49 = vrot.slane %v455_v47, 2 }
 0x11b   : > { %v403_v50 = vrot.slane %v402_v48, 1  ;;  %v457_v51 = vadd.f32 %v456_v49, %v455_v47 }
 0x11d   : > { %v404_v52 = vadd.f32 %v403_v50, %v402_v48  ;;  %v458_v53 = vrot.slane %v457_v51, 1 }
 0x11f   : > { %406 = vst.msk [vmem:[%s167_s6] sm:$0x1] %vm405_vm4, %v404_v52  ;;  %v459_v54 = vadd.f32 %v458_v53, %v457_v51 }
 0x120   : > { %695 = shalt.err (!%p692_p3)
}
 0x121   : > { %s696_s26 = scalar_lea.hbm %s907_s16, 16  ;;  %s700_s6 = scalar_lea.hbm %s986_s2, 32 }
 0x122   : > { %p697_p4 = scmp.ne.s32.totalorder %s907_s16, %s696_s26  ;;  %p701_p9 = scmp.lt.u32.totalorder %s907_s16, %s986_s2 }
 0x123   : > { %p702_p10 = scmp.lt.u32.totalorder %s700_s6, %s696_s26  ;;  %p704_p12 = scmp.lt.u32.totalorder %s696_s26, %s907_s16 }
 0x124   : > { %p698_p7 = pnand %p697_p4, %p836_p5 }
 0x125   : > { %p703_p11 = por %p702_p10, %p701_p9 }
 0x126   : > { %p699_p8 = pneg %p698_p7 }
 0x127   : > { %p705_p13 = por %p704_p12, %p703_p11 }
 0x129   : > { %p706_p0 = pnand %p705_p13, %p699_p8 }
 0x12b   : > { %709 = shalt.err (!%p706_p0)
}
 0x12c   : > { %629 = dma.vmem_to_hbm [thread:$0]  (%p836_p5), %s909_s7, 16, %s907_s16, %s462_s24   ;;  %460 = vst.msk [vmem:[%s173_s8] sm:$0x1] %vm405_vm4, %v459_v54 }
 0x12d   : > { %s466_s17 = scalar_lea.sflag [#allocation5], %s897_s5  ;;  %s710_s19 = scalar_lea.vmem %s918_s9, 16 }
 0x12e   : > { %p711_p1 = scmp.ne.s32.totalorder %s918_s9, %s710_s19  ;;  %s780_s25 = smov [#allocation4]  }
 0x12f   : > { %s714_s27 = sshll.u32 %s780_s25, 4  ;;  %s715_s27 = int_to_ptr.vmem [resolvable:$false] %s714_s27 }
 0x130   : > { %p712_p2 = pnand %p711_p1, %p836_p5  ;;  %s716_s28 = scalar_lea.vmem %s715_s27, 32 }
 0x131   : > { %p717_p4 = scmp.lt.s32.totalorder %s918_s9, %s715_s27  ;;  %p718_p7 = scmp.lt.s32.totalorder %s716_s28, %s710_s19 }
 0x132   : > { %p713_p3 = pneg %p712_p2 }
 0x133   : > { %p719_p8 = por %p718_p7, %p717_p4 }
 0x135   : > { %p720_p9 = pnand %p719_p8, %p713_p3 }
 0x137   : > { %723 = shalt.err (!%p720_p9)
}
 0x138   : > { %s724_s5 = scalar_lea.hbm %s916_s20, 16  ;;  %s728_s16 = scalar_lea.hbm %s987_s3, 32 }
 0x139   : > { %p725_p10 = scmp.ne.s32.totalorder %s916_s20, %s724_s5  ;;  %p729_p13 = scmp.lt.u32.totalorder %s916_s20, %s987_s3 }
 0x13a   : > { %p730_p0 = scmp.lt.u32.totalorder %s728_s16, %s724_s5  ;;  %p732_p2 = scmp.lt.u32.totalorder %s724_s5, %s916_s20 }
 0x13b   : > { %p726_p11 = pnand %p725_p10, %p836_p5 }
 0x13c   : > { %p731_p1 = por %p730_p0, %p729_p13 }
 0x13d   : > { %p727_p12 = pneg %p726_p11 }
 0x13e   : > { %p733_p3 = por %p732_p2, %p731_p1 }
 0x140   : > { %p734_p4 = pnand %p733_p3, %p727_p12 }
 0x142   : > { %737 = shalt.err (!%p734_p4)
}
 0x143   : > { %630 = dma.vmem_to_hbm [thread:$0]  (%p836_p5), %s918_s9, 16, %s916_s20, %s466_s17  }
 0x144 PF: > { %p640_p7 = scmp.ge.s32.totalorder %s776_s15, 2  ;;  %s503_s26 = sand.u32 1, %s764_s12  }
 0x145   : > { %s504_s30 = scalar_lea.sflag [#allocation3], %s503_s26 }
 0x146   : > { %p634_p8 = pnand %p640_p7, %p840_p6 }
 0x148   : > { %755 = dma.done.wait (!%p634_p8), %s504_s30, 16  }
 0x149   : > { %757 = vsyncadd (!%p634_p8), %s504_s30, 4294967280  ;;  %s512_s4 = scalar_lea.sflag [#allocation5], %s503_s26 }
 0x14a   : > { %759 = dma.done.wait (!%p634_p8), %s512_s4, 16  }
 0x14b   : > { %761 = vsyncadd (!%p634_p8), %s512_s4, 4294967280  ;;  %p17_p5 = scmp.ge.s32.totalorder %s824_s18, 4   ;;  %s990_s12 = smov %s768_s13 }
 0x14c   : > { %s991_s13 = smov %s772_s14  ;;  %s992_s14 = smov %s834_s21 }
 0x14d   : > { %s993_s15 = smov %s824_s18  ;;  %19 = sbr.rel (!%p17_p5) target bundleno = 5 (0x5), region = 80 }
 0x154   :  { %516 = vsyncpa [#allocation3], 1 }
 0x155   :  { %518 = vsyncpa [#allocation3 + $0x1], 1 }
 0x156   :  { %519 = vsyncpa [#allocation5], 1 }
 0x157   :  { %521 = vsyncpa [#allocation5 + $0x1], 1 }

</bundles_post_ra>
